<compile_context>
chip_gen: v7x
topology: tpu7x:2x2x1
jax: 0.10.0
libtpu: 0.0.40
codegen_flags: <defaults>
</compile_context>

<pallas_src>
import jax
import jax.numpy as jnp
from jax.experimental import pallas as pl
from jax.experimental.pallas import tpu as pltpu

HID1 = 128
HID2 = 256


def _round_up(x, m):
    return ((x + m - 1) // m) * m


def critic_kernel(state_ref, action_ref, w1s_ref, w1a_ref, b1_ref,
                  w2_ref, b2_ref, w3_ref, b3_ref, out_ref):
    s = state_ref[...]
    a = action_ref[...]

    # Layer 1: fused concat -> split matmul (avoids a wrapper-side concat copy).
    h1 = (jnp.dot(s, w1s_ref[...], preferred_element_type=jnp.float32)
          + jnp.dot(a, w1a_ref[...], preferred_element_type=jnp.float32)
          + b1_ref[...])
    h1 = jnp.maximum(h1, 0.0)

    # Layer 2: the only "real" MXU matmul (128 x 256).
    h2 = jnp.dot(h1, w2_ref[...], preferred_element_type=jnp.float32) + b2_ref[...]
    h2 = jnp.maximum(h2, 0.0)

    # Layer 3: N=1 -> VPU multiply + lane reduction instead of a padded MXU tile.
    v = jnp.sum(h2 * w3_ref[...], axis=-1, keepdims=True) + b3_ref[0, 0]
    out_ref[...] = v.astype(out_ref.dtype)


def critic_forward(state, action, params, *, tile_b=512):
    """state: [B, S] f32, action: [B, A] f32 -> [B, 1] f32."""
    w1, b1, w2, b2, w3, b3 = params
    B, S = state.shape
    A = action.shape[1]

    # Split W1 so the kernel never needs the concatenated input.
    w1s = w1[:S]                     # [S, 128]
    w1a = w1[S:]                     # [A, 128]
    w3_row = w3.reshape(1, HID2)     # [1, 256] row for the VPU reduction

    # Batch tile: multiple of 8 sublanes; pad batch so the grid divides evenly.
    tb = min(tile_b, _round_up(B, 8))
    Bp = _round_up(B, tb)
    if Bp != B:
        pad = Bp - B
        state = jnp.pad(state, ((0, pad), (0, 0)))
        action = jnp.pad(action, ((0, pad), (0, 0)))

    grid = (pl.cdiv(Bp, tb),)

    def resident(shape):
        # Same block every grid step -> stays in VMEM, no re-DMA.
        return pl.BlockSpec(shape, lambda i: (0, 0))

    out = pl.pallas_call(
        critic_kernel,
        out_shape=jax.ShapeDtypeStruct((Bp, 1), jnp.float32),
        grid=grid,
        in_specs=[
            pl.BlockSpec((tb, S), lambda i: (i, 0)),            # state tile
            pl.BlockSpec((tb, A), lambda i: (i, 0)),            # action tile
            resident((S, HID1)),                                # w1 (state part)
            resident((A, HID1)),                                # w1 (action part)
            resident((1, HID1)),                                # b1
            resident((HID1, HID2)),                             # w2
            resident((1, HID2)),                                # b2
            resident((1, HID2)),                                # w3 as row
            pl.BlockSpec(memory_space=pltpu.MemorySpace.SMEM),  # b3 scalar
        ],
        out_specs=pl.BlockSpec((tb, 1), lambda i: (i, 0)),
        compiler_params=pltpu.CompilerParams(
            dimension_semantics=("parallel",)),
    )(state, action, w1s, w1a, b1, w2, b2, w3_row, b3)

    return out[:B]


def init_params(state_size, action_size, key):
    """Matches Critic.weight_init: N(0, 0.01) weights, zero bias.
    Weights stored as [in, out] (transpose of PyTorch's [out, in]) for x @ W."""
    k1, k2, k3 = jax.random.split(key, 3)
    in_dim = state_size + action_size
    w1 = 0.01 * jax.random.normal(k1, (in_dim, HID1), dtype=jnp.float32)
    b1 = jnp.zeros((1, HID1), dtype=jnp.float32)
    w2 = 0.01 * jax.random.normal(k2, (HID1, HID2), dtype=jnp.float32)
    b2 = jnp.zeros((1, HID2), dtype=jnp.float32)
    w3 = 0.01 * jax.random.normal(k3, (HID2, 1), dtype=jnp.float32)
    b3 = jnp.zeros((1, 1), dtype=jnp.float32)
    return (w1, b1, w2, b2, w3, b3)


def critic_reference(state, action, params):
    """Pure-JAX reference for correctness check."""
    w1, b1, w2, b2, w3, b3 = params
    x = jnp.concatenate([state, action], axis=1)
    h1 = jnp.maximum(x @ w1 + b1, 0.0)
    h2 = jnp.maximum(h1 @ w2 + b2, 0.0)
    return h2 @ w3 + b3


if __name__ == "__main__":
    batch = 2
    state_size = 8
    action_size = 4

    key = jax.random.PRNGKey(0)
    kp, ks, ka = jax.random.split(key, 3)

    params = init_params(state_size, action_size, kp)
    state = jax.random.normal(ks, (batch, state_size), dtype=jnp.float32)
    action = jax.random.normal(ka, (batch, action_size), dtype=jnp.float32)

    value = critic_forward(state, action, params)
    jax.block_until_ready(value)

    ref = critic_reference(state, action, params)
    assert value.shape == (batch, 1), value.shape
    assert jnp.allclose(value, ref, atol=1e-5, rtol=1e-5), (value, ref)

    print("KERNEL_OK")
</pallas_src>

<mosaic_0001>
module attributes {stable_mosaic.version = 11 : i64} {
  func.func @critic_kernel(%arg0: i32, %arg1: memref<8x8xf32, #tpu.memory_space<vmem>>, %arg2: memref<8x4xf32, #tpu.memory_space<vmem>>, %arg3: memref<8x128xf32, #tpu.memory_space<vmem>>, %arg4: memref<4x128xf32, #tpu.memory_space<vmem>>, %arg5: memref<1x128xf32, #tpu.memory_space<vmem>>, %arg6: memref<128x256xf32, #tpu.memory_space<vmem>>, %arg7: memref<1x256xf32, #tpu.memory_space<vmem>>, %arg8: memref<1x256xf32, #tpu.memory_space<vmem>>, %arg9: memref<1x1xf32, #tpu.memory_space<smem>>, %arg10: memref<8x1xf32, #tpu.memory_space<vmem>>) attributes {dimension_semantics = [#tpu.dimension_semantics<parallel>], iteration_bounds = array<i64: 1>, scalar_prefetch = 0 : i64, scratch_operands = 0 : i64, tpu.core_type = #tpu.core_type<tc>, window_params = [{transform_indices = @transform_0, window_bounds = array<i64: 8, 8>}, {transform_indices = @transform_1, window_bounds = array<i64: 8, 4>}, {pipeline_mode = #tpu.pipeline_mode<synchronous>, transform_indices = @transform_2, window_bounds = array<i64: 8, 128>}, {pipeline_mode = #tpu.pipeline_mode<synchronous>, transform_indices = @transform_3, window_bounds = array<i64: 4, 128>}, {pipeline_mode = #tpu.pipeline_mode<synchronous>, transform_indices = @transform_4, window_bounds = array<i64: 1, 128>}, {pipeline_mode = #tpu.pipeline_mode<synchronous>, transform_indices = @transform_5, window_bounds = array<i64: 128, 256>}, {pipeline_mode = #tpu.pipeline_mode<synchronous>, transform_indices = @transform_6, window_bounds = array<i64: 1, 256>}, {pipeline_mode = #tpu.pipeline_mode<synchronous>, transform_indices = @transform_7, window_bounds = array<i64: 1, 256>}, {transform_indices = @transform_8, window_bounds = array<i64: 1, 1>}, {transform_indices = @transform_9, window_bounds = array<i64: 8, 1>}]} {
    %c0 = arith.constant 0 : index
    %c0_0 = arith.constant 0 : index
    %0 = vector.load %arg1[%c0, %c0_0] : memref<8x8xf32, #tpu.memory_space<vmem>>, vector<8x8xf32>
    %c0_1 = arith.constant 0 : index
    %c0_2 = arith.constant 0 : index
    %1 = vector.load %arg2[%c0_1, %c0_2] : memref<8x4xf32, #tpu.memory_space<vmem>>, vector<8x4xf32>
    %c0_3 = arith.constant 0 : index
    %c0_4 = arith.constant 0 : index
    %2 = vector.load %arg3[%c0_3, %c0_4] : memref<8x128xf32, #tpu.memory_space<vmem>>, vector<8x128xf32>
    %cst = arith.constant dense<0.000000e+00> : vector<8x128xf32>
    %3 = tpu.matmul %0, %2, %cst {dimension_numbers = #tpu.dot_dimension_numbers<[1], [0], [0], [1], [0, 0, 1, 1], [], []>} : vector<8x8xf32>, vector<8x128xf32>, vector<8x128xf32> -> vector<8x128xf32>
    %c0_5 = arith.constant 0 : index
    %c0_6 = arith.constant 0 : index
    %4 = vector.load %arg4[%c0_5, %c0_6] : memref<4x128xf32, #tpu.memory_space<vmem>>, vector<4x128xf32>
    %cst_7 = arith.constant dense<0.000000e+00> : vector<8x128xf32>
    %5 = tpu.matmul %1, %4, %cst_7 {dimension_numbers = #tpu.dot_dimension_numbers<[1], [0], [0], [1], [0, 0, 1, 1], [], []>} : vector<8x4xf32>, vector<4x128xf32>, vector<8x128xf32> -> vector<8x128xf32>
    %6 = arith.addf %3, %5 : vector<8x128xf32>
    %c0_8 = arith.constant 0 : index
    %c0_9 = arith.constant 0 : index
    %7 = vector.load %arg5[%c0_8, %c0_9] : memref<1x128xf32, #tpu.memory_space<vmem>>, vector<1x128xf32>
    %8 = vector.broadcast %7 : vector<1x128xf32> to vector<8x128xf32>
    %9 = arith.addf %6, %8 : vector<8x128xf32>
    %cst_10 = arith.constant 0.000000e+00 : f32
    %10 = vector.broadcast %cst_10 : f32 to vector<8x128xf32>
    %11 = arith.maximumf %9, %10 : vector<8x128xf32>
    %c0_11 = arith.constant 0 : index
    %c0_12 = arith.constant 0 : index
    %12 = vector.load %arg6[%c0_11, %c0_12] : memref<128x256xf32, #tpu.memory_space<vmem>>, vector<128x256xf32>
    %cst_13 = arith.constant dense<0.000000e+00> : vector<8x256xf32>
    %13 = tpu.matmul %11, %12, %cst_13 {dimension_numbers = #tpu.dot_dimension_numbers<[1], [0], [0], [1], [0, 0, 1, 1], [], []>} : vector<8x128xf32>, vector<128x256xf32>, vector<8x256xf32> -> vector<8x256xf32>
    %c0_14 = arith.constant 0 : index
    %c0_15 = arith.constant 0 : index
    %14 = vector.load %arg7[%c0_14, %c0_15] : memref<1x256xf32, #tpu.memory_space<vmem>>, vector<1x256xf32>
    %15 = vector.broadcast %14 : vector<1x256xf32> to vector<8x256xf32>
    %16 = arith.addf %13, %15 : vector<8x256xf32>
    %cst_16 = arith.constant 0.000000e+00 : f32
    %17 = vector.broadcast %cst_16 : f32 to vector<8x256xf32>
    %18 = arith.maximumf %16, %17 : vector<8x256xf32>
    %c0_17 = arith.constant 0 : index
    %c0_18 = arith.constant 0 : index
    %19 = vector.load %arg8[%c0_17, %c0_18] : memref<1x256xf32, #tpu.memory_space<vmem>>, vector<1x256xf32>
    %20 = vector.broadcast %19 : vector<1x256xf32> to vector<8x256xf32>
    %21 = arith.mulf %18, %20 : vector<8x256xf32>
    %cst_19 = arith.constant dense<0.000000e+00> : vector<8xf32>
    %22 = vector.multi_reduction <add>, %21, %cst_19 [1] : vector<8x256xf32> to vector<8xf32>
    %23 = vector.shape_cast %22 : vector<8xf32> to vector<8x1xf32>
    %c0_20 = arith.constant 0 : index
    %c0_21 = arith.constant 0 : index
    %24 = memref.load %arg9[%c0_20, %c0_21] : memref<1x1xf32, #tpu.memory_space<smem>>
    %25 = vector.broadcast %24 : f32 to vector<8x1xf32>
    %26 = arith.addf %23, %25 : vector<8x1xf32>
    %c0_22 = arith.constant 0 : index
    %c0_23 = arith.constant 0 : index
    %27 = vector.load %arg10[%c0_22, %c0_23] : memref<8x1xf32, #tpu.memory_space<vmem>>, vector<8x1xf32>
    tpu.vector_store %arg10[%c0_22, %c0_23], %26 {strides = array<i32>} : memref<8x1xf32, #tpu.memory_space<vmem>>, vector<8x1xf32>,
    return
  }
  func.func @transform_0(%arg0: i32) -> (i32, i32) {
    %c0_i32 = arith.constant 0 : i32
    %c0_i32_0 = arith.constant 0 : i32
    return %arg0, %c0_i32 : i32, i32
  }
  func.func @transform_1(%arg0: i32) -> (i32, i32) {
    %c0_i32 = arith.constant 0 : i32
    %c0_i32_0 = arith.constant 0 : i32
    return %arg0, %c0_i32 : i32, i32
  }
  func.func @transform_2(%arg0: i32) -> (i32, i32) {
    %c0_i32 = arith.constant 0 : i32
    %c0_i32_0 = arith.constant 0 : i32
    %c0_i32_1 = arith.constant 0 : i32
    return %c0_i32, %c0_i32_0 : i32, i32
  }
  func.func @transform_3(%arg0: i32) -> (i32, i32) {
    %c0_i32 = arith.constant 0 : i32
    %c0_i32_0 = arith.constant 0 : i32
    %c0_i32_1 = arith.constant 0 : i32
    return %c0_i32, %c0_i32_0 : i32, i32
  }
  func.func @transform_4(%arg0: i32) -> (i32, i32) {
    %c0_i32 = arith.constant 0 : i32
    %c0_i32_0 = arith.constant 0 : i32
    %c0_i32_1 = arith.constant 0 : i32
    return %c0_i32, %c0_i32_0 : i32, i32
  }
  func.func @transform_5(%arg0: i32) -> (i32, i32) {
    %c0_i32 = arith.constant 0 : i32
    %c0_i32_0 = arith.constant 0 : i32
    %c0_i32_1 = arith.constant 0 : i32
    return %c0_i32, %c0_i32_0 : i32, i32
  }
  func.func @transform_6(%arg0: i32) -> (i32, i32) {
    %c0_i32 = arith.constant 0 : i32
    %c0_i32_0 = arith.constant 0 : i32
    %c0_i32_1 = arith.constant 0 : i32
    return %c0_i32, %c0_i32_0 : i32, i32
  }
  func.func @transform_7(%arg0: i32) -> (i32, i32) {
    %c0_i32 = arith.constant 0 : i32
    %c0_i32_0 = arith.constant 0 : i32
    %c0_i32_1 = arith.constant 0 : i32
    return %c0_i32, %c0_i32_0 : i32, i32
  }
  func.func @transform_8(%arg0: i32) -> (i32, i32) {
    %c0_i32 = arith.constant 0 : i32
    %c0_i32_0 = arith.constant 0 : i32
    %c0_i32_1 = arith.constant 0 : i32
    return %c0_i32, %c0_i32_0 : i32, i32
  }
  func.func @transform_9(%arg0: i32) -> (i32, i32) {
    %c0_i32 = arith.constant 0 : i32
    %c0_i32_0 = arith.constant 0 : i32
    return %arg0, %c0_i32 : i32, i32
  }
}

</mosaic_0001>

<bundles_post_ra>
// kernel: tpu_custom_call.1
= control target key start
LH: loop header
LB: loop body
LE: loop exit
PB: predicated region body
PF: predicated region fallthrough
CT: control target
= control target key end

     0   :  { %15 = vsyncpa [#allocation4], 0  ;;  %s435_s30 = smov [#allocation3]   ;;  %s531_s0 = inlined_call_operand.vmem [shape: f32[8,8], index: 0, kind: input, shape index: {}]   ;;  %s532_s1 = inlined_call_operand.vmem [shape: f32[8,4], index: 1, kind: input, shape index: {}]   ;;  %s533_s2 = inlined_call_operand.vmem [shape: f32[8,128], index: 2, kind: input, shape index: {}]   ;;  %s534_s3 = inlined_call_operand.vmem [shape: f32[4,128], index: 3, kind: input, shape index: {}]   ;;  %s535_s4 = inlined_call_operand.vmem [shape: f32[1,128], index: 4, kind: input, shape index: {}]   ;;  %s536_s5 = inlined_call_operand.hbm [shape: f32[128,256], index: 5, kind: input, shape index: {}]   ;;  %s537_s6 = inlined_call_operand.vmem [shape: f32[1,256], index: 6, kind: input, shape index: {}]   ;;  %s538_s7 = inlined_call_operand.vmem [shape: f32[1,256], index: 7, kind: input, shape index: {}]   ;;  %s539_s8 = inlined_call_operand.<no memory space> [shape: f32[1,1], index: 8, kind: input, shape index: {}]   ;;  %s540_s9 = inlined_call_operand.vmem [shape: f32[8,1], index: 9, kind: output, shape index: {}]  }
   0x1   :  { %s31_s10 = sshll.u32 %s435_s30, 4  ;;  %s411_s13 = scalar_lea.hbm %s536_s5, 4096  ;;  %s32_s10 = int_to_ptr.vmem [resolvable:$true] %s31_s10 }
   0x2   :  { %p412_p0 = scmp.ne.s32.totalorder %s536_s5, %s411_s13  ;;  %p415_p1 = scmp.lt.u32.totalorder %s411_s13, %s536_s5 }
   0x4   :  { %p417_p2 = pnand %p415_p1, %p412_p0 }
   0x6   :  { %420 = shalt.err (!%p417_p2)
}
   0x7   :  { %s421_s18 = scalar_lea.vmem %s32_s10, 4096  ;;  %p426_p4 = scmp.lt.s32.totalorder %s32_s10, %s32_s10 }
   0x8   :  { %p422_p3 = scmp.ne.s32.totalorder %s32_s10, %s421_s18  ;;  %p427_p5 = scmp.lt.s32.totalorder %s421_s18, %s421_s18 }
   0xa   :  { %p428_p6 = por %p427_p5, %p426_p4 }
   0xc   :  { %p429_p7 = pnand %p428_p6, %p422_p3 }
   0xe   :  { %432 = shalt.err (!%p429_p7)
}
   0xf   :  { %s436_s19 = smov 256   ;;  %s437_s20 = smov 16  }
  0x10   :  { %37 = dma.hbm_to_vmem [thread:$0]  %s536_s5, 4096, %s32_s10, [#allocation4], %s436_s19, %s436_s19, %s437_s20  }
  0x11   :  { %433 = dma.done.wait [#allocation4], 4096  }
  0x12   :  { %434 = vsyncadd [#allocation4], 4294963200  ;;  %v438_v0 = vmov 0.0   ;;  %vm439_vm0 = vmmov 0   ;;  %vm55_vm1 = vcmask 1043456   ;;  %vm51_vm2 = vcmask 31744  }
  0x13   :  { %364 = vmatprep.subr.mxu1 %v438_v0  ;;  %366 = vmatprep.mubr.msk.f32.mxu1 %vm439_vm0, %v438_v0  ;;  %v50_v1 = vld [vmem:[%s534_s3] sm:$0xf]  ;;  %v213_v5 = vld [vmem:[#allocation3 + $0x8] sm:$0xff]  ;;  %v215_v6 = vld [vmem:[#allocation3 + $0x18] sm:$0xff]  ;;  %vm129_vm3 = vcmask 64512   ;;  %v246_v61 = vlaneseq  ;;  %vm349_vm4 = vcmask 7168  }
  0x14   :  { %320 = vmatprep.mubr.f32.mxu0 %v438_v0  ;;  %v48_v2 = vld [vmem:[%s532_s1] sm:$0xff]  ;;  %365 = vmatpush3.msk.msra.mxu1 %vm55_vm1, %v50_v1  ;;  %v374_v7 = vpack.c.bf16 %v215_v6, %v213_v5  ;;  %v214_v9 = vld [vmem:[#allocation3 + $0x10] sm:$0xff]  ;;  %v217_v10 = vld [vmem:[#allocation3 + $0x28] sm:$0xff] }
  0x15   :  { %v49_v3 = vld [vmem:[%s533_s2] sm:$0xff]  ;;  %367 = vmatmul.mubr.msk.f32.vlgmr.msra.gmra.mrb[0].mxu1 %vm51_vm2, %v48_v2  ;;  %369 = vmatprep.subr.mxu1 %v438_v0  ;;  %v219_v12 = vld [vmem:[#allocation3 + $0x38] sm:$0xff]  ;;  %v218_v14 = vld [vmem:[#allocation3 + $0x30] sm:$0xff]  ;;  %v247_v62 = vshrl.u32 %v246_v61, 7 }
  0x16   :  { %v47_v4 = vld [vmem:[%s531_s0] sm:$0xff]  ;;  %370 = vmatpush3.msra.mxu1 %v49_v3  ;;  %371 = vmatprep.mubr.msk.f32.mxu1 %vm439_vm0, %v438_v0  ;;  %v378_v15 = vpack.c.bf16 %v219_v12, %v217_v10  ;;  %v221_v16 = vld [vmem:[#allocation3 + $0x48] sm:$0xff]  ;;  %v223_v17 = vld [vmem:[#allocation3 + $0x58] sm:$0xff] }
  0x17   :  { %v212_v8 = vld [vmem:[#allocation3] sm:$0xff]  ;;  %375 = vmatprep.subr.bf16.mxu0 %v374_v7  ;;  %v382_v19 = vpack.c.bf16 %v223_v17, %v221_v16  ;;  %v222_v21 = vld [vmem:[#allocation3 + $0x50] sm:$0xff]  ;;  %v225_v22 = vld [vmem:[#allocation3 + $0x68] sm:$0xff]  ;;  %v248_v63 = vsub.s32 0, %v247_v62  ;;  %v252_v1 = vsub.s32 1, %v247_v62  ;;  %v347_v16 = vstv %s539_s8 }
  0x18   :  { %v376_v11 = vpack.c.bf16 %v214_v9, %v212_v8  ;;  %v216_v13 = vld [vmem:[#allocation3 + $0x20] sm:$0xff]  ;;  %v227_v23 = vld [vmem:[#allocation3 + $0x78] sm:$0xff]  ;;  %v226_v27 = vld [vmem:[#allocation3 + $0x70] sm:$0xff] }
  0x19   :  { %v380_v18 = vpack.c.bf16 %v218_v14, %v216_v13  ;;  %372 = vmatmul.mubr.msk.f32.vlgmr.msra.gmra.mrb[2].mxu1 %vm129_vm3, %v47_v4  ;;  %v220_v20 = vld [vmem:[#allocation3 + $0x40] sm:$0xff]  ;;  %v386_v25 = vpack.c.bf16 %v227_v23, %v225_v22  ;;  %v229_v28 = vld [vmem:[#allocation3 + $0x88] sm:$0xff]  ;;  %v231_v29 = vld [vmem:[#allocation3 + $0x98] sm:$0xff] }
  0x1a   :  { %377 = vmatpush1.bf16.msra.mxu0 %v376_v11  ;;  %v384_v24 = vpack.c.bf16 %v222_v21, %v220_v20  ;;  %v224_v26 = vld [vmem:[#allocation3 + $0x60] sm:$0xff]  ;;  %v390_v31 = vpack.c.bf16 %v231_v29, %v229_v28  ;;  %v230_v33 = vld [vmem:[#allocation3 + $0x90] sm:$0xff]  ;;  %v233_v34 = vld [vmem:[#allocation3 + $0xa8] sm:$0xff] }
  0x1b   :  { %379 = vmatprep.subr.bf16.mxu0 %v378_v15  ;;  %v388_v30 = vpack.c.bf16 %v226_v27, %v224_v26  ;;  %v228_v32 = vld [vmem:[#allocation3 + $0x80] sm:$0xff]  ;;  %v235_v35 = vld [vmem:[#allocation3 + $0xb8] sm:$0xff]  ;;  %v234_v39 = vld [vmem:[#allocation3 + $0xb0] sm:$0xff] }
  0x1c   :  { %v392_v36 = vpack.c.bf16 %v230_v33, %v228_v32  ;;  %v394_v37 = vpack.c.bf16 %v235_v35, %v233_v34  ;;  %v232_v38 = vld [vmem:[#allocation3 + $0xa0] sm:$0xff]  ;;  %v237_v41 = vld [vmem:[#allocation3 + $0xc8] sm:$0xff]  ;;  %v239_v42 = vld [vmem:[#allocation3 + $0xd8] sm:$0xff] }
  0x1d   :  { %v396_v40 = vpack.c.bf16 %v234_v39, %v232_v38  ;;  %v398_v43 = vpack.c.bf16 %v239_v42, %v237_v41  ;;  %v236_v44 = vld [vmem:[#allocation3 + $0xc0] sm:$0xff]  ;;  %v238_v45 = vld [vmem:[#allocation3 + $0xd0] sm:$0xff]  ;;  %v241_v47 = vld [vmem:[#allocation3 + $0xe8] sm:$0xff] }
  0x1e   :  { %381 = vmatpush1.bf16.msra.mxu0 %v380_v18  ;;  %v400_v46 = vpack.c.bf16 %v238_v45, %v236_v44  ;;  %v243_v48 = vld [vmem:[#allocation3 + $0xf8] sm:$0xff]  ;;  %v240_v50 = vld [vmem:[#allocation3 + $0xe0] sm:$0xff]  ;;  %v242_v51 = vld [vmem:[#allocation3 + $0xf0] sm:$0xff] }
  0x1f   :  { %383 = vmatprep.subr.bf16.mxu0 %v382_v19  ;;  %v402_v49 = vpack.c.bf16 %v243_v48, %v241_v47  ;;  %v404_v52 = vpack.c.bf16 %v242_v51, %v240_v50  ;;  %v359_v56 = vld [vmem:[%s535_s4] ss:$0 sm:$0xff] }
  0x20   :  { %v244_v0 = vld [vmem:[%s537_s6] sm:$0x3] }
  0x21   :  { %v249_v2 = vrot.slane %v244_v0, %v248_v63  ;;  %v253_v3 = vrot.slane %v244_v0, %v252_v1  ;;  %v329_v4 = vld [vmem:[%s538_s7] sm:$0x3] }
  0x22   :  { %385 = vmatpush1.bf16.msra.mxu0 %v384_v24  ;;  %v334_v8 = vrot.slane %v329_v4, %v248_v63  ;;  %v338_v10 = vrot.slane %v329_v4, %v252_v1 }
  0x23   :  { %387 = vmatprep.subr.bf16.mxu0 %v386_v25 }
  0x26   :  { %389 = vmatpush1.bf16.msra.mxu0 %v388_v30 }
  0x27   :  { %391 = vmatprep.subr.bf16.mxu0 %v390_v31 }
  0x2a   :  { %393 = vmatpush1.bf16.msra.mxu0 %v392_v36 }
  0x2b   :  { %395 = vmatprep.subr.bf16.mxu0 %v394_v37 }
  0x2e   :  { %397 = vmatpush1.bf16.msra.mxu0 %v396_v40 }
  0x2f   :  { %399 = vmatprep.subr.bf16.mxu0 %v398_v43 }
  0x32   :  { %401 = vmatpush1.bf16.msra.mxu0 %v400_v46 }
  0x33   :  { %403 = vmatprep.subr.bf16.mxu0 %v402_v49 }
  0x36   :  { %405 = vmatpush1.bf16.msra.mxu0 %v404_v52 }
  0xe8   :  { %v125_v53 = vpop.f32.mrb[0].mxu1 }
  0xe9   :  { %v368_v54 = vpop.f32.mrb[1].mxu1 }
  0xec   :  { %v199_v55 = vpop.f32.mrb[2].mxu1 }
  0xed   :  { %v200_v57 = vadd.f32 %v199_v55, %v125_v53  ;;  %v373_v58 = vpop.f32.mrb[3].mxu1 }
  0xef   :  { %v210_v59 = vadd.f32 %v359_v56, %v200_v57 }
  0xf1   :  { %v211_v60 = vmax.f32 %v210_v59, 0.0 }
  0xf3   :  { %321 = vmatmul.mubr.f32.vlgmr.msra.gmra.mrb[0].mxu0 %v211_v60 }
 0x1c6   :  { %v322_v5 = vpop.f32.mrb[0].mxu0 }
 0x1c7   :  { %v323_v6 = vadd.f32 %v322_v5, %v249_v2  ;;  %v324_v7 = vpop.f32.mrb[1].mxu0 }
 0x1c8   :  { %v325_v9 = vadd.f32 %v324_v7, %v253_v3 }
 0x1c9   :  { %v327_v11 = vmax.f32 %v323_v6, 0.0 }
 0x1ca   :  { %v328_v12 = vmax.f32 %v325_v9, 0.0 }
 0x1cb   :  { %v341_v13 = vmul.f32 %v334_v8, %v327_v11 }
 0x1cc   :  { %v342_v14 = vmul.f32 %v338_v10, %v328_v12 }
 0x1ce   :  { %v343_v15 = vadd.f32 %v342_v14, %v341_v13 }
 0x1d0   :  { %344 = vadd.xlane.f32.xlu0 %v343_v15 }
 0x25d   :  { %v345_v17 = vpop.xlane.xlu0 %344 }
 0x25e   :  { %v348_v18 = vadd.f32 %v347_v16, %v345_v17 }
 0x260   :  { %350 = vst.msk [vmem:[%s540_s9] sm:$0xff] %vm349_vm4, %v348_v18 }
 0x261   :  { %355 = vsyncpa [#allocation4], 1 }

</bundles_post_ra>
